<compile_context>
chip_gen: v6e
topology: v6e:2x2x1
jax: 0.10.0
libtpu: 0.0.40
codegen_flags: <defaults>
</compile_context>

<pallas_src>
import functools
import math

import jax
import jax.numpy as jnp
from jax import lax
from jax.experimental import pallas as pl
from jax.experimental.pallas import tpu as pltpu

LANE = 128      # lane (last-dim) alignment
SUBLANE = 8     # sublane (row) alignment


# ----------------------------------------------------------------------------
# small helpers
# ----------------------------------------------------------------------------
def _round_up(n, m):
    return (n + m - 1) // m * m


def _pad2d(x, rows, cols):
    return jnp.pad(x, ((0, rows - x.shape[0]), (0, cols - x.shape[1])))


def _vmem_limit(block_bytes):
    # 2x for double-buffering + 4 MiB slack; clamp to [16 MiB, 64 MiB] so the
    # same number is valid on v5e/v6e (128 MiB) and v7x (64 MiB physical).
    return int(min(max(2 * block_bytes + (4 << 20), 16 << 20), 64 << 20))


# ----------------------------------------------------------------------------
# Pallas kernels
# ----------------------------------------------------------------------------
def _linear_kernel(x_ref, w_ref, b_ref, o_ref, *, activation):
    y = jnp.dot(x_ref[...], w_ref[...], preferred_element_type=jnp.float32)
    y = y + b_ref[...]
    if activation == "relu":
        y = jnp.maximum(y, 0.0)
    o_ref[...] = y.astype(o_ref.dtype)


def pallas_linear(x, w, b, *, activation="none", row_tile=256):
    """act(x @ w + b).  x:(M,K) bf16 (M % row_tile == 0), w:(K,N) bf16, b:(1,N) f32."""
    M, K = x.shape
    N = w.shape[1]
    assert M % row_tile == 0, (M, row_tile)
    tm = row_tile
    block_bytes = tm * K * 2 + K * N * 2 + N * 4 + tm * N * 2
    return pl.pallas_call(
        functools.partial(_linear_kernel, activation=activation),
        out_shape=jax.ShapeDtypeStruct((M, N), jnp.bfloat16),
        grid=(M // tm,),
        in_specs=[
            pl.BlockSpec((tm, K), lambda i: (i, 0)),
            pl.BlockSpec((K, N), lambda i: (0, 0)),
            pl.BlockSpec((1, N), lambda i: (0, 0)),
        ],
        out_specs=pl.BlockSpec((tm, N), lambda i: (i, 0)),
        compiler_params=pltpu.CompilerParams(
            dimension_semantics=("parallel",),
            vmem_limit_bytes=_vmem_limit(block_bytes)),
    )(x, w, b)


def _sage_chain_kernel(a_ref, zs_ref, zd_ref, wl_ref, wr_ref, bl_ref,
                       wf_ref, bf_ref, wo_ref, bo_ref, o_ref, agg_ref):
    k = pl.program_id(1)

    @pl.when(k == 0)
    def _():
        agg_ref[...] = jnp.zeros_like(agg_ref)

    # mean neighbor aggregation, accumulated over source-node (K) tiles
    agg_ref[...] += jnp.dot(a_ref[...], zs_ref[...],
                            preferred_element_type=jnp.float32)

    @pl.when(k == pl.num_programs(1) - 1)
    def _():
        # SAGEConv: two K=H bf16 dots (no concat, z_dst stays bf16), then ReLU
        h = jnp.dot(agg_ref[...].astype(jnp.bfloat16), wl_ref[...],
                    preferred_element_type=jnp.float32)
        h = h + jnp.dot(zd_ref[...], wr_ref[...],
                        preferred_element_type=jnp.float32)
        h = jnp.maximum(h + bl_ref[...], 0.0)
        # feed-forward Linear + ReLU
        h = jnp.dot(h.astype(jnp.bfloat16), wf_ref[...],
                    preferred_element_type=jnp.float32) + bf_ref[...]
        h = jnp.maximum(h, 0.0)
        # output projection Linear
        y = jnp.dot(h.astype(jnp.bfloat16), wo_ref[...],
                    preferred_element_type=jnp.float32) + bo_ref[...]
        o_ref[...] = y.astype(o_ref.dtype)


def pallas_sage_chain(a_norm, z_src, z_dst, w_l, w_r, b_l, w_ffw, b_ffw,
                      w_out, b_out, *, row_tile=256, k_tile=128):
    """Fused: out_proj( relu( ffw( relu(SAGEConv_mean(a, z_src, z_dst)) ) ) )."""
    Nd, Ns = a_norm.shape
    H = w_l.shape[1]
    assert Nd % row_tile == 0 and Ns % k_tile == 0, (Nd, Ns, row_tile, k_tile)
    tm, tk = row_tile, k_tile
    block_bytes = (tm * tk * 2 + tk * H * 2 + tm * H * 2 + 4 * H * H * 2
                   + 3 * H * 4 + tm * H * 2 + tm * H * 4)
    return pl.pallas_call(
        _sage_chain_kernel,
        out_shape=jax.ShapeDtypeStruct((Nd, H), jnp.bfloat16),
        grid=(Nd // tm, Ns // tk),
        in_specs=[
            pl.BlockSpec((tm, tk), lambda i, k: (i, k)),   # adjacency tile
            pl.BlockSpec((tk, H), lambda i, k: (k, 0)),    # z_src K-tile
            pl.BlockSpec((tm, H), lambda i, k: (i, 0)),    # z_dst rows
            pl.BlockSpec((H, H), lambda i, k: (0, 0)),     # W_l (neighbor)
            pl.BlockSpec((H, H), lambda i, k: (0, 0)),     # W_r (root)
            pl.BlockSpec((1, H), lambda i, k: (0, 0)),     # b_l
            pl.BlockSpec((H, H), lambda i, k: (0, 0)),     # W_ffw
            pl.BlockSpec((1, H), lambda i, k: (0, 0)),     # b_ffw
            pl.BlockSpec((H, H), lambda i, k: (0, 0)),     # W_out_proj
            pl.BlockSpec((1, H), lambda i, k: (0, 0)),     # b_out_proj
        ],
        out_specs=pl.BlockSpec((tm, H), lambda i, k: (i, 0)),
        scratch_shapes=[pltpu.VMEM((tm, H), jnp.float32)],
        compiler_params=pltpu.CompilerParams(
            dimension_semantics=("parallel", "arbitrary"),
            vmem_limit_bytes=_vmem_limit(block_bytes)),
    )(a_norm, z_src, z_dst, w_l, w_r, b_l, w_ffw, b_ffw, w_out, b_out)


def _decoder_kernel(zs_ref, zt_ref, ws_ref, wt_ref, bm_ref, wo_ref, bo_ref, o_ref):
    # concat-free MLP: cat([zs, zt]) @ W_mlp == zs @ W_src + zt @ W_tgt
    h = jnp.dot(zs_ref[...], ws_ref[...], preferred_element_type=jnp.float32)
    h = h + jnp.dot(zt_ref[...], wt_ref[...], preferred_element_type=jnp.float32)
    h = jnp.maximum(h + bm_ref[...], 0.0)
    # Lane-dense output: N=1 projection done as (1, D) @ (tm, D)^T (trans_b is
    # folded into dot_general dimension numbers, no explicit transpose), so the
    # per-tile result is a (1, tm) row -> unmasked full-lane stores.
    y = lax.dot_general(wo_ref[...], h.astype(jnp.bfloat16),
                        dimension_numbers=(((1,), (1,)), ((), ())),
                        preferred_element_type=jnp.float32)      # (1, tm)
    y = jax.nn.sigmoid(y + bo_ref[...])
    o_ref[...] = y[None].astype(o_ref.dtype)                     # (1, 1, tm)


def pallas_edge_decoder(z_src_rows, z_tgt_rows, w_src, w_tgt, b_mlp,
                        w_out_row, b_out, *, row_tile=256):
    E, H = z_src_rows.shape
    D = w_src.shape[1]
    assert E % row_tile == 0, (E, row_tile)
    tm = row_tile
    n_tiles = E // tm
    block_bytes = 2 * tm * H * 2 + 2 * H * D * 2 + D * 4 + D * 2 + 4 + tm * 4
    out = pl.pallas_call(
        _decoder_kernel,
        out_shape=jax.ShapeDtypeStruct((n_tiles, 1, tm), jnp.float32),
        grid=(n_tiles,),
        in_specs=[
            pl.BlockSpec((tm, H), lambda i: (i, 0)),
            pl.BlockSpec((tm, H), lambda i: (i, 0)),
            pl.BlockSpec((H, D), lambda i: (0, 0)),
            pl.BlockSpec((H, D), lambda i: (0, 0)),
            pl.BlockSpec((1, D), lambda i: (0, 0)),
            pl.BlockSpec((1, D), lambda i: (0, 0)),   # w_out as a row
            pl.BlockSpec((1, 1), lambda i: (0, 0)),
        ],
        out_specs=pl.BlockSpec((1, 1, tm), lambda i: (i, 0, 0)),
        compiler_params=pltpu.CompilerParams(
            dimension_semantics=("parallel",),
            vmem_limit_bytes=_vmem_limit(block_bytes)),
    )(z_src_rows, z_tgt_rows, w_src, w_tgt, b_mlp, w_out_row, b_out)
    return out.reshape(-1)


# ----------------------------------------------------------------------------
# One-time graph preprocessing (hoisted out of the hot path)
# ----------------------------------------------------------------------------
def mean_adjacency(edge_index, num_src, num_dst):
    """Row-normalized dense adjacency (num_dst, num_src) = mean over in-neighbors."""
    src, dst = edge_index[0], edge_index[1]
    a = jnp.zeros((num_dst, num_src), jnp.float32).at[dst, src].add(1.0)
    deg = a.sum(axis=1, keepdims=True)
    return a / jnp.maximum(deg, 1.0)


def preprocess_graph(x_dict, edge_index_dict, node_types, edge_types, *, pad_multiple):
    num_nodes = {nt: x_dict[nt].shape[0] for nt in node_types}
    # pad node rows to a multiple of BOTH the row tile and the k tile so the
    # same z array can serve as destination rows and source K-tiles.
    n_pad = {nt: _round_up(num_nodes[nt], pad_multiple) for nt in node_types}
    x_pad = {}
    for nt in node_types:
        Fp = _round_up(x_dict[nt].shape[1], LANE)
        x_pad[nt] = _pad2d(x_dict[nt], n_pad[nt], Fp).astype(jnp.bfloat16)
    a_pad = {}
    for et in edge_types:
        src_t, _, dst_t = et
        a = mean_adjacency(edge_index_dict[et], num_nodes[src_t], num_nodes[dst_t])
        a_pad[et] = _pad2d(a, n_pad[dst_t], n_pad[src_t]).astype(jnp.bfloat16)
    return x_pad, a_pad, num_nodes


# ----------------------------------------------------------------------------
# Parameters (synthetic) + one-time packing (pad to lanes, bf16)
# ----------------------------------------------------------------------------
def init_linear(key, in_dim, out_dim, scale=0.1):
    k1, k2 = jax.random.split(key)
    w = scale * jax.random.normal(k1, (in_dim, out_dim), jnp.float32)
    b = 0.01 * jax.random.normal(k2, (out_dim,), jnp.float32)
    return w, b


def build_params(key, hidden, feat_dims, node_types, edge_types):
    keys = iter(jax.random.split(key, 64))
    params = {"proj_in": {}, "conv": {}, "ffw": {}, "out_proj": {}}
    for nt in node_types:
        params["proj_in"][nt] = init_linear(next(keys), feat_dims[nt], hidden)
        params["ffw"][nt] = init_linear(next(keys), hidden, hidden)
        params["out_proj"][nt] = init_linear(next(keys), hidden, hidden)
    for et in edge_types:
        w_l, b_l = init_linear(next(keys), hidden, hidden)   # neighbor weight (+bias)
        w_r, _ = init_linear(next(keys), hidden, hidden)     # root weight (no bias, PyG)
        params["conv"][et] = (w_l, b_l, w_r)
    # TODO(synk): MultiLayerPercetronLayer source unavailable; modeled as
    #             num_layers x (Linear(2H, 2H) + ReLU), dropout=0.
    params["dec_mlp"] = init_linear(next(keys), 2 * hidden, 2 * hidden)
    params["dec_out"] = init_linear(next(keys), 2 * hidden, 1)
    return params


def _pack_w(w, rows, cols):
    return _pad2d(w, rows, cols).astype(jnp.bfloat16)


def _pack_b(b, cols):
    return _pad2d(b.reshape(1, -1), 1, cols).astype(jnp.float32)


def pack_params(params, hidden, feat_dims, node_types, edge_types):
    Hp = _round_up(hidden, LANE)
    Dp = _round_up(2 * hidden, LANE)
    packed = {"proj_in": {}, "conv": {}, "ffw": {}, "out_proj": {}}
    for nt in node_types:
        Fp = _round_up(feat_dims[nt], LANE)
        w, b = params["proj_in"][nt]
        packed["proj_in"][nt] = (_pack_w(w, Fp, Hp), _pack_b(b, Hp))
        w, b = params["ffw"][nt]
        packed["ffw"][nt] = (_pack_w(w, Hp, Hp), _pack_b(b, Hp))
        w, b = params["out_proj"][nt]
        packed["out_proj"][nt] = (_pack_w(w, Hp, Hp), _pack_b(b, Hp))
    for et in edge_types:
        w_l, b_l, w_r = params["conv"][et]
        packed["conv"][et] = (_pack_w(w_l, Hp, Hp), _pack_w(w_r, Hp, Hp),
                              _pack_b(b_l, Hp))
    # decoder: split (2H, 2H) MLP weight into src/tgt halves (concat-free kernel)
    w_mlp, b_mlp = params["dec_mlp"]
    packed["dec_w_src"] = _pack_w(w_mlp[:hidden], Hp, Dp)
    packed["dec_w_tgt"] = _pack_w(w_mlp[hidden:], Hp, Dp)
    packed["dec_b_mlp"] = _pack_b(b_mlp, Dp)
    w_out, b_out = params["dec_out"]                          # (2H, 1), (1,)
    packed["dec_w_out_row"] = _pack_w(w_out.T, 1, Dp)         # (1, Dp) bf16 row
    packed["dec_b_out"] = b_out.reshape(1, 1).astype(jnp.float32)
    return packed


# ----------------------------------------------------------------------------
# Forward pass
# ----------------------------------------------------------------------------
def material_edge_predictor_forward(
    packed, x_pad, a_pad, edge_label_index, node_types, edge_types,
    src_node_name="materials", tgt_node_name="elements",
    row_tile=256, k_tile=128,
):
    # row_tile guidance: 256-512 on v5e/v6e (128 MiB VMEM), 128-256 on v7x (64 MiB).

    # 1. per-node-type input projection (use_projections=True, use_embeddings=False)
    z = {nt: pallas_linear(x_pad[nt], *packed["proj_in"][nt], row_tile=row_tile)
         for nt in node_types}

    # 2-4. fused per-destination-type chain:
    #      SAGEConv(mean) + ReLU -> FFW Linear + ReLU -> output projection.
    new_z = {}
    for nt in node_types:
        incoming = [et for et in edge_types if et[2] == nt]
        # TODO(synk): this metadata has exactly one incoming edge type per dst type;
        #             multiple incoming types would need summing before the ReLU.
        assert len(incoming) == 1
        et = incoming[0]
        w_l, w_r, b_l = packed["conv"][et]
        w_f, b_f = packed["ffw"][nt]
        w_o, b_o = packed["out_proj"][nt]
        new_z[nt] = pallas_sage_chain(
            a_pad[et], z[et[0]], z[nt], w_l, w_r, b_l, w_f, b_f, w_o, b_o,
            row_tile=row_tile, k_tile=k_tile)
    z = new_z

    # 5. EdgeDecoder. Row gather is XLA glue; MLP + out Linear + sigmoid fused.
    # TODO(synk): for very large E, fuse the gather into the decoder via
    #             PrefetchScalarGridSpec (edge_label_index in SMEM) to avoid the
    #             two extra (E, H) HBM arrays.
    row, col = edge_label_index[0], edge_label_index[1]
    zs = jnp.take(z[src_node_name], row, axis=0)
    zt = jnp.take(z[tgt_node_name], col, axis=0)
    E = zs.shape[0]
    Ep = _round_up(E, row_tile)
    zs = _pad2d(zs, Ep, zs.shape[1])
    zt = _pad2d(zt, Ep, zt.shape[1])
    out = pallas_edge_decoder(
        zs, zt, packed["dec_w_src"], packed["dec_w_tgt"], packed["dec_b_mlp"],
        packed["dec_w_out_row"], packed["dec_b_out"], row_tile=row_tile)
    return out[:E]


# ----------------------------------------------------------------------------
# Demo
# ----------------------------------------------------------------------------
if __name__ == "__main__":
    hidden = 32
    node_types = ["materials", "elements"]
    edge_types = [
        ("materials", "has", "elements"),
        ("elements", "rev_has", "materials"),
    ]
    # Sized so that after padding to 128-row tiles both grid axes have >1 step.
    num_nodes = {"materials": 200, "elements": 150}
    feat_dims = {"materials": 8, "elements": 6}
    row_tile, k_tile = 128, 128
    pad_multiple = math.lcm(row_tile, k_tile)

    key = jax.random.PRNGKey(0)
    k_feat, k_edge, k_label, k_param = jax.random.split(key, 4)

    # node features
    kf = jax.random.split(k_feat, len(node_types))
    x_dict = {
        nt: jax.random.normal(kf[i], (num_nodes[nt], feat_dims[nt]), jnp.float32)
        for i, nt in enumerate(node_types)
    }

    # edges materials -> elements (and its reverse)
    n_edges = 600
    ke1, ke2 = jax.random.split(k_edge)
    src_m = jax.random.randint(ke1, (n_edges,), 0, num_nodes["materials"])
    dst_e = jax.random.randint(ke2, (n_edges,), 0, num_nodes["elements"])
    edge_index_dict = {
        ("materials", "has", "elements"): jnp.stack([src_m, dst_e]),
        ("elements", "rev_has", "materials"): jnp.stack([dst_e, src_m]),
    }

    # supervision edges (materials -> elements)
    n_label = 300
    kl1, kl2 = jax.random.split(k_label)
    edge_label_index = jnp.stack([
        jax.random.randint(kl1, (n_label,), 0, num_nodes["materials"]),
        jax.random.randint(kl2, (n_label,), 0, num_nodes["elements"]),
    ])

    raw_params = build_params(k_param, hidden, feat_dims, node_types, edge_types)
    packed = pack_params(raw_params, hidden, feat_dims, node_types, edge_types)

    # one-time preprocessing (adjacency build + padding) outside the hot path
    x_pad, a_pad, _ = preprocess_graph(
        x_dict, edge_index_dict, node_types, edge_types, pad_multiple=pad_multiple)

    out = material_edge_predictor_forward(
        packed, x_pad, a_pad, edge_label_index, node_types, edge_types,
        src_node_name="materials", tgt_node_name="elements",
        row_tile=row_tile, k_tile=k_tile)
    out = jax.block_until_ready(out)
    assert out.shape == (n_label,)
    assert bool(jnp.all(jnp.isfinite(out)))
    assert bool(jnp.all((out >= 0.0) & (out <= 1.0)))
    print("KERNEL_OK")
</pallas_src>

<mosaic_0001>
module attributes {stable_mosaic.version = 11 : i64} {
  func.func @_linear_kernel(%arg0: i32, %arg1: memref<128x128xbf16, #tpu.memory_space<vmem>>, %arg2: memref<128x128xbf16, #tpu.memory_space<vmem>>, %arg3: memref<1x128xf32, #tpu.memory_space<vmem>>, %arg4: memref<128x128xbf16, #tpu.memory_space<vmem>>) attributes {dimension_semantics = [#tpu.dimension_semantics<parallel>], iteration_bounds = array<i64: 2>, scalar_prefetch = 0 : i64, scratch_operands = 0 : i64, tpu.core_type = #tpu.core_type<tc>, window_params = [{transform_indices = @transform_0, window_bounds = array<i64: 128, 128>}, {pipeline_mode = #tpu.pipeline_mode<synchronous>, transform_indices = @transform_1, window_bounds = array<i64: 128, 128>}, {pipeline_mode = #tpu.pipeline_mode<synchronous>, transform_indices = @transform_2, window_bounds = array<i64: 1, 128>}, {transform_indices = @transform_3, window_bounds = array<i64: 128, 128>}]} {
    %c0 = arith.constant 0 : index
    %c0_0 = arith.constant 0 : index
    %0 = vector.load %arg1[%c0, %c0_0] : memref<128x128xbf16, #tpu.memory_space<vmem>>, vector<128x128xbf16>
    %c0_1 = arith.constant 0 : index
    %c0_2 = arith.constant 0 : index
    %1 = vector.load %arg2[%c0_1, %c0_2] : memref<128x128xbf16, #tpu.memory_space<vmem>>, vector<128x128xbf16>
    %cst = arith.constant dense<0.000000e+00> : vector<128x128xf32>
    %2 = tpu.matmul %0, %1, %cst {dimension_numbers = #tpu.dot_dimension_numbers<[1], [0], [0], [1], [0, 0, 1, 1], [], []>} : vector<128x128xbf16>, vector<128x128xbf16>, vector<128x128xf32> -> vector<128x128xf32>
    %c0_3 = arith.constant 0 : index
    %c0_4 = arith.constant 0 : index
    %3 = vector.load %arg3[%c0_3, %c0_4] : memref<1x128xf32, #tpu.memory_space<vmem>>, vector<1x128xf32>
    %4 = vector.broadcast %3 : vector<1x128xf32> to vector<128x128xf32>
    %5 = arith.addf %2, %4 : vector<128x128xf32>
    %6 = arith.truncf %5 : vector<128x128xf32> to vector<128x128xbf16>
    %c0_5 = arith.constant 0 : index
    %c0_6 = arith.constant 0 : index
    %7 = vector.load %arg4[%c0_5, %c0_6] : memref<128x128xbf16, #tpu.memory_space<vmem>>, vector<128x128xbf16>
    tpu.vector_store %arg4[%c0_5, %c0_6], %6 {strides = array<i32>} : memref<128x128xbf16, #tpu.memory_space<vmem>>, vector<128x128xbf16>,
    return
  }
  func.func @transform_0(%arg0: i32) -> (i32, i32) {
    %c0_i32 = arith.constant 0 : i32
    %c0_i32_0 = arith.constant 0 : i32
    return %arg0, %c0_i32 : i32, i32
  }
  func.func @transform_1(%arg0: i32) -> (i32, i32) {
    %c0_i32 = arith.constant 0 : i32
    %c0_i32_0 = arith.constant 0 : i32
    %c0_i32_1 = arith.constant 0 : i32
    return %c0_i32, %c0_i32_0 : i32, i32
  }
  func.func @transform_2(%arg0: i32) -> (i32, i32) {
    %c0_i32 = arith.constant 0 : i32
    %c0_i32_0 = arith.constant 0 : i32
    %c0_i32_1 = arith.constant 0 : i32
    return %c0_i32, %c0_i32_0 : i32, i32
  }
  func.func @transform_3(%arg0: i32) -> (i32, i32) {
    %c0_i32 = arith.constant 0 : i32
    %c0_i32_0 = arith.constant 0 : i32
    return %arg0, %c0_i32 : i32, i32
  }
}

</mosaic_0001>

<bundles_post_ra>
// kernel: tpu_custom_call.1
= control target key start
LH: loop header
LB: loop body
LE: loop exit
PB: predicated region body
PF: predicated region fallthrough
CT: control target
= control target key end

     0   :  { %8 = vsyncpa [#allocation3], 0  ;;  %s1233_s0 = inlined_call_operand.hbm [shape: bf16[256,128], index: 0, kind: input, shape index: {}]   ;;  %s1234_s1 = inlined_call_operand.hbm [shape: bf16[128,128], index: 1, kind: input, shape index: {}]   ;;  %s1235_s2 = inlined_call_operand.vmem [shape: f32[1,128], index: 2, kind: input, shape index: {}]   ;;  %s1236_s3 = inlined_call_operand.hbm [shape: bf16[256,128], index: 3, kind: output, shape index: {}]  }
   0x1   :  { %10 = vsyncpa [#allocation3 + $0x1], 0 }
   0x2   :  { %11 = vsyncpa [#allocation6], 0 }
   0x3   :  { %12 = vsyncpa [#allocation4], 0 }
   0x4   :  { %14 = vsyncpa [#allocation4 + $0x1], 0  ;;  %s1022_s12 = smov 0   ;;  %s1024_s13 = smov 0  }
   0x5   :  { %s1026_s14 = smov 0   ;;  %s1028_s15 = smov 0  }
   0x6 LB: > { %s1043_s16 = sadd.s32 4294967295, %s993_s15   ;;  %s616_s17 = sadd.s32 4294967294, %s993_s15   ;;  %s993_s15 = sphi %s1028_s15, %s1258_s15   ;;  %s989_s14 = sphi %s1026_s14, %s1257_s14   ;;  %s985_s13 = sphi %s1024_s13, %s1256_s13   ;;  %s981_s12 = sphi %s1022_s12, %s1255_s12  }
   0x7   : > { %p40_p0 = scmp.ne.s32.totalorder %s985_s13, %s981_s12  ;;  %p1237_p1 = scmp.eq.s32.totalorder %s1043_s16, 0 }
   0x8   : > { %p112_p3 = scmp.eq.s32.totalorder %s616_s17, 1  ;;  %p617_p5 = scmp.ge.s32.totalorder %s993_s15, 1 }
   0x9   : > { %p1052_p4 = por %p1237_p1, %p40_p0  ;;  %p119_p7 = scmp.lt.s32.totalorder %s993_s15, 3 }
   0xa   : > { %p1057_p6 = por %p112_p3, %p40_p0  ;;  %s995_s21 = smov [#allocation5]  }
   0xb   : > { %s1241_s18 = scalar_select %p1052_p4, 1, 0 }
   0xc   : > { %s1242_s19 = scalar_select %p1057_p6, 1, 0 }
   0xd   : > { %p1062_p8 = pnand %p617_p5, %p119_p7  ;;  %s131_s22 = sshll.u32 %s995_s21, 4  ;;  %s132_s22 = int_to_ptr.vmem [resolvable:$true] %s131_s22 }
   0xe   : > { %s1076_s24 = sadd.s32 1, %s993_s15   ;;  %s27_s25 = sadd.s32 1, %s989_s14 }
   0xf   : > { %s1243_s20 = scalar_select %p1062_p8, 1, 0 }
  0x10   : > { %p802_p9 = pneg %p1062_p8  ;;  %s24_s26 = ssub.s32 %s993_s15, %s1076_s24 }
  0x11   : > { %s882_s27 = scalar_lea.vmem %s132_s22, 1024  ;;  %p890_p5 = scmp.lt.s32.totalorder %s132_s22, %s132_s22 }
  0x12   : > { %p1071_p11 = pnand %p802_p9, %p1237_p1  ;;  %p883_p13 = scmp.ne.s32.totalorder %s132_s22, %s882_s27 }
  0x13   : > { %p891_p7 = scmp.lt.s32.totalorder %s882_s27, %s882_s27 }
  0x14   : > { %p873_p12 = pneg %p1071_p11 }
  0x15   : > { %p892_p10 = por %p891_p7, %p890_p5 }
  0x16   : > { %p885_p0 = pnand %p883_p13, %p873_p12 }
  0x18   : > { %p886_p3 = pneg %p885_p0 }
  0x1a   : > { %p893_p2 = pnand %p892_p10, %p886_p3 }
  0x1c   : > { %896 = shalt.err (!%p893_p2)
}
  0x1d   : > { %s996_s28 = smov 64   ;;  %s997_s29 = smov 4  }
  0x1e   : > { %805 = dma.hbm_to_vmem [thread:$0]  (!%p1071_p11), %s1234_s1, 1024, %s132_s22, [#allocation6], %s996_s28, %s996_s28, %s997_s29  }
  0x1f   : > { %p25_p2 = scmp.eq.s32.totalorder %s24_s26, 0  ;;  %p34_p9 = scmp.ne.s32.totalorder %s989_s14, %s985_s13 }
  0x20   : > { %p35_p10 = scmp.eq.s32.totalorder %s993_s15, 0  ;;  %p815_p12 = scmp.lt.s32.totalorder %s993_s15, 2 }
  0x21   : > { %s1096_s5 = scalar_select %p25_p2, %s989_s14, %s27_s25  }
  0x22   : > { %p36_p13 = por %p35_p10, %p34_p9  ;;  %p1245_p0 = scmp.eq.s32.totalorder %s1043_s16, 1 }
  0x23   : > { %s148_s7 = sand.u32 1, %s989_s14   ;;  %s665_s8 = sshll.u32 %s993_s15, 10 }
  0x24   : > { %p1100_p3 = por %p1245_p0, %p34_p9  ;;  %s620_s9 = sshll.u32 %s148_s7, 6 }
  0x25   : > { %s1109_s17 = scalar_lea.hbm %s1233_s0, %s665_s8  ;;  %s152_s21 = scalar_lea.vmem [#allocation2], %s620_s9 }
  0x26   : > { %s1246_s6 = scalar_select %p1100_p3, 1, 0 }
  0x27   : > { %s159_s22 = sshll.u32 %s152_s21, 4  ;;  %p1111_p11 = pnand %p815_p12, %p36_p13  ;;  %s1115_s22 = int_to_ptr.vmem [resolvable:$true] %s159_s22 }
  0x28   : > { %s1117_s25 = scalar_lea.sflag [#allocation3], %s148_s7  ;;  %s897_s26 = scalar_lea.hbm %s1109_s17, 1024 }
  0x29   : > { %p898_p5 = scmp.ne.s32.totalorder %s1109_s17, %s897_s26  ;;  %p899_p7 = pneg %p1111_p11 }
  0x2a   : > { %s902_s4 = scalar_lea.hbm %s1233_s0, 2048  ;;  %p903_p10 = scmp.lt.s32.totalorder %s1109_s17, %s1233_s0 }
  0x2b   : > { %p900_p2 = pnand %p899_p7, %p898_p5  ;;  %p904_p12 = scmp.lt.s32.totalorder %s902_s4, %s897_s26 }
  0x2d   : > { %p901_p9 = pneg %p900_p2  ;;  %p905_p13 = por %p904_p12, %p903_p10 }
  0x2f   : > { %p906_p0 = pnand %p905_p13, %p901_p9 }
  0x31   : > { %909 = shalt.err (!%p906_p0)
}
  0x32   : > { %s910_s7 = scalar_lea.vmem %s1115_s22, 1024  ;;  %s998_s10 = smov [#allocation2]  }
  0x33   : > { %p911_p1 = scmp.ne.s32.totalorder %s1115_s22, %s910_s7  ;;  %s915_s11 = sshll.u32 %s998_s10, 4  ;;  %s916_s11 = int_to_ptr.vmem [resolvable:$false] %s915_s11 }
  0x34   : > { %s917_s21 = scalar_lea.vmem %s916_s11, 2048  ;;  %p918_p2 = scmp.lt.s32.totalorder %s1115_s22, %s916_s11 }
  0x35   : > { %p913_p6 = pnand %p911_p1, %p899_p7  ;;  %p919_p3 = scmp.lt.s32.totalorder %s917_s21, %s910_s7 }
  0x37   : > { %p914_p5 = pneg %p913_p6  ;;  %p920_p4 = por %p919_p3, %p918_p2 }
  0x39   : > { %p921_p8 = pnand %p920_p4, %p914_p5 }
  0x3b   : > { %924 = shalt.err (!%p921_p8)
}
  0x3c   : > { %809 = dma.hbm_to_vmem [thread:$0]  (!%p1111_p11), %s1109_s17, 1024, %s1115_s22, %s1117_s25, %s996_s28, %s996_s28, %s997_s29  }
  0x3d   : > { %p1248_p1 = scmp.ne.s32.totalorder %s1243_s20, 0 }
  0x3e   : > { %s1144_s26 = sand.u32 (!%p1248_p1), 1, %s985_s13   ;;  %p1249_p4 = scmp.ne.s32.totalorder (!%p1248_p1), %s1241_s18, 0 }
  0x3f   : > { %171 = sbr.rel (%p1248_p1) target bundleno = 330 (0x14a), region = 32  ;;  %s624_s27 = sshll.u32 (!%p1248_p1), %s1144_s26, 6 }
  0x40   : > { %s174_s30 = scalar_lea.sflag (!%p1248_p1), [#allocation3], %s1144_s26  ;;  %s1150_s23 = scalar_lea.vmem (!%p1248_p1), [#allocation2], %s624_s27 }
  0x44   : > { %968 = dma.done.wait (%p1249_p4), %s174_s30, 1024  }
  0x45   : > { %970 = vsyncadd (%p1249_p4), %s174_s30, 4294966272  ;;  %p1250_p6 = scmp.eq.s32.totalorder %s1043_s16, 0 }
  0x47   : > { %972 = dma.done.wait (%p1250_p6), [#allocation6], 1024   ;;  %p1251_p8 = pmov %p1250_p6 }
  0x48   : > { %v855_v0 = vld [vmem:[#allocation5 + $0x38] sm:$0xff]   ;;  %v856_v1 = vld [vmem:[#allocation5 + $0x30] sm:$0xff]   ;;  %v857_v2 = vld [vmem:[#allocation5 + $0x28] sm:$0xff]   ;;  %s1173_s28 = scalar_lea.vmem [#allocation7], %s624_s27  ;;  %s682_s17 = sshll.u32 %s1043_s16, 10 }
  0x49   : > { %974 = vsyncadd (%p1251_p8), [#allocation6], 4294966272  ;;  %746 = vmatprep.subr.bf16.mxu0 %v855_v0  ;;  %778 = vmatprep.subr.bf16.mxu1 %v855_v0  ;;  %v858_v3 = vld [vmem:[#allocation5 + $0x20] sm:$0xff]   ;;  %v859_v6 = vld [vmem:[#allocation5 + $0x18] sm:$0xff]   ;;  %s533_s29 = sshll.u32 %s1173_s28, 4  ;;  %s1186_s4 = scalar_lea.hbm %s1236_s3, %s682_s17  ;;  %s1181_s29 = int_to_ptr.vmem [resolvable:$true] %s533_s29 }
  0x4a   : > { %747 = vmatpush3.bf16.msra.mxu0 %v855_v0  ;;  %786 = vmatpush3.bf16.msra.mxu1 %v855_v0  ;;  %v863_v4 = vld [vmem:[%s1150_s23] sm:$0xff]   ;;  %v860_v7 = vld [vmem:[#allocation5 + $0x10] sm:$0xff]   ;;  %v861_v8 = vld [vmem:[#allocation5 + $0x8] sm:$0xff]   ;;  %s520_s16 = scalar_lea.sflag [#allocation4], %s1144_s26  ;;  %s925_s8 = scalar_lea.vmem %s1181_s29, 1024 }
  0x4b   : > { %748 = vmatprep.subr.bf16.mxu0 %v856_v1  ;;  %779 = vmatprep.subr.bf16.mxu1 %v856_v1  ;;  %v864_v5 = vld [vmem:[%s1150_s23 + $0x20] sm:$0xff]   ;;  %v865_v10 = vld [vmem:[%s1150_s23 + $0x8] sm:$0xff]   ;;  %v867_v12 = vld [vmem:[%s1150_s23 + $0x10] sm:$0xff]   ;;  %p926_p3 = scmp.ne.s32.totalorder %s1181_s29, %s925_s8  ;;  %p1252_p11 = scmp.ne.s32.totalorder %s1246_s6, 0 }
  0x4c   : > { %762 = vmatprep.mubr.bf16.mxu0 %v863_v4  ;;  %770 = vmatprep.mubr.bf16.mxu1 %v864_v5  ;;  %v862_v9 = vld [vmem:[#allocation5] sm:$0xff]   ;;  %v866_v11 = vld [vmem:[%s1150_s23 + $0x28] sm:$0xff]   ;;  %v868_v13 = vld [vmem:[%s1150_s23 + $0x30] sm:$0xff]   ;;  %s999_s9 = smov [#allocation7]  }
  0x4d   : > { %v869_v14 = vld [vmem:[%s1150_s23 + $0x18] sm:$0xff]   ;;  %v627_v18 = vld [vmem:[%s1235_s2] ss:$0 sm:$0xff]  ;;  %p927_p7 = pnand %p926_p3, %p1252_p11  ;;  %s929_s7 = sshll.u32 %s999_s9, 4  ;;  %s930_s7 = int_to_ptr.vmem [resolvable:$false] %s929_s7 }
  0x4e   : > { %749 = vmatpush3.bf16.msra.mxu0 %v856_v1  ;;  %787 = vmatpush3.bf16.msra.mxu1 %v856_v1  ;;  %v870_v15 = vld [vmem:[%s1150_s23 + $0x38] sm:$0xff]   ;;  %s931_s10 = scalar_lea.vmem %s930_s7, 2048  ;;  %p932_p10 = scmp.lt.s32.totalorder %s1181_s29, %s930_s7 }
  0x4f   : > { %750 = vmatprep.subr.bf16.mxu0 %v857_v2  ;;  %780 = vmatprep.subr.bf16.mxu1 %v857_v2  ;;  %p928_p9 = pneg %p927_p7  ;;  %p933_p12 = scmp.lt.s32.totalorder %s931_s10, %s925_s8 }
  0x51   : > { %p934_p13 = por %p933_p12, %p932_p10 }
  0x52   : > { %751 = vmatpush3.bf16.msra.mxu0 %v857_v2  ;;  %788 = vmatpush3.bf16.msra.mxu1 %v857_v2 }
  0x53   : > { %752 = vmatprep.subr.bf16.mxu0 %v858_v3  ;;  %781 = vmatprep.subr.bf16.mxu1 %v858_v3  ;;  %p935_p0 = pnand %p934_p13, %p928_p9 }
  0x56   : > { %753 = vmatpush3.bf16.msra.mxu0 %v858_v3  ;;  %789 = vmatpush3.bf16.msra.mxu1 %v858_v3 }
  0x57   : > { %754 = vmatprep.subr.bf16.mxu0 %v859_v6  ;;  %782 = vmatprep.subr.bf16.mxu1 %v859_v6 }
  0x5a   : > { %755 = vmatpush3.bf16.msra.mxu0 %v859_v6  ;;  %790 = vmatpush3.bf16.msra.mxu1 %v859_v6 }
  0x5b   : > { %756 = vmatprep.subr.bf16.mxu0 %v860_v7  ;;  %783 = vmatprep.subr.bf16.mxu1 %v860_v7 }
  0x5e   : > { %757 = vmatpush3.bf16.msra.mxu0 %v860_v7  ;;  %791 = vmatpush3.bf16.msra.mxu1 %v860_v7 }
  0x5f   : > { %758 = vmatprep.subr.bf16.mxu0 %v861_v8  ;;  %784 = vmatprep.subr.bf16.mxu1 %v861_v8 }
  0x62   : > { %759 = vmatpush3.bf16.msra.mxu0 %v861_v8  ;;  %792 = vmatpush3.bf16.msra.mxu1 %v861_v8 }
  0x63   : > { %760 = vmatprep.subr.bf16.mxu0 %v862_v9  ;;  %785 = vmatprep.subr.bf16.mxu1 %v862_v9 }
  0x66   : > { %761 = vmatpush3.bf16.msra.mxu0 %v862_v9  ;;  %793 = vmatpush3.bf16.msra.mxu1 %v862_v9 }
  0x69   : > { %763 = vmatmul.mubr.bf16.vlgmr.msra.gmra.mxu0 %v865_v10  ;;  %771 = vmatmul.mubr.bf16.vlgmr.msra.gmra.mxu1 %v866_v11 }
  0x6a   : > { %766 = vmatprep.mubr.bf16.mxu0 %v867_v12  ;;  %774 = vmatprep.mubr.bf16.mxu1 %v868_v13 }
  0x71   : > { %767 = vmatmul.mubr.bf16.gmra.mxu0 %v869_v14  ;;  %775 = vmatmul.mubr.bf16.gmra.mxu1 %v870_v15 }
 0x129   : > { %v764_v16 = vpop.f32.mrf.mxu0  ;;  %v772_v17 = vpop.f32.mrf.mxu1 }
 0x12a   : > { %v385_v23 = vadd.f32 %v764_v16, %v627_v18  ;;  %v417_v24 = vadd.f32 %v772_v17, %v627_v18 }
 0x12b   : > { %v376_v19 = vpop.f32.mrf.mxu0  ;;  %v408_v20 = vpop.f32.mrf.mxu1 }
 0x12c   : > { %v377_v27 = vadd.f32 %v627_v18, %v376_v19  ;;  %v409_v28 = vadd.f32 %v627_v18, %v408_v20 }
 0x12d   : > { %v765_v21 = vpop.f32.mrf.mxu0  ;;  %v773_v22 = vpop.f32.mrf.mxu1 }
 0x12e   : > { %v388_v25 = vadd.f32 %v765_v21, %v627_v18  ;;  %v420_v26 = vadd.f32 %v773_v22, %v627_v18 }
 0x12f   : > { %v379_v29 = vpop.f32.mrf.mxu0  ;;  %v411_v30 = vpop.f32.mrf.mxu1 }
 0x130   : > { %v691_v31 = vpack.c.bf16 %v388_v25, %v385_v23  ;;  %v711_v32 = vpack.c.bf16 %v420_v26, %v417_v24  ;;  %v380_v33 = vadd.f32 %v627_v18, %v379_v29  ;;  %v412_v34 = vadd.f32 %v627_v18, %v411_v30 }
 0x131   : > { %v768_v35 = vpop.f32.mrf.mxu0  ;;  %v776_v36 = vpop.f32.mrf.mxu1 }
 0x132   : > { %723 = vst [vmem:[%s1173_s28 + $0x8] sm:$0xff] %v691_v31   ;;  %727 = vst [vmem:[%s1173_s28 + $0x28] sm:$0xff] %v711_v32   ;;  %v686_v37 = vpack.c.bf16 %v380_v33, %v377_v27  ;;  %v706_v38 = vpack.c.bf16 %v412_v34, %v409_v28  ;;  %v401_v43 = vadd.f32 %v768_v35, %v627_v18 }
 0x133   : > { %v392_v39 = vpop.f32.mrf.mxu0  ;;  %v424_v40 = vpop.f32.mrf.mxu1  ;;  %v433_v44 = vadd.f32 %v776_v36, %v627_v18 }
 0x134   : > { %687 = vst [vmem:[%s1173_s28] sm:$0xff] %v686_v37   ;;  %726 = vst [vmem:[%s1173_s28 + $0x20] sm:$0xff] %v706_v38   ;;  %v393_v47 = vadd.f32 %v627_v18, %v392_v39  ;;  %v425_v48 = vadd.f32 %v627_v18, %v424_v40 }
 0x135   : > { %v769_v41 = vpop.f32.mrf.mxu0  ;;  %v777_v42 = vpop.f32.mrf.mxu1 }
 0x136   : > { %v404_v45 = vadd.f32 %v769_v41, %v627_v18  ;;  %v436_v46 = vadd.f32 %v777_v42, %v627_v18 }
 0x137   : > { %v395_v49 = vpop.f32.mrf.mxu0  ;;  %v427_v50 = vpop.f32.mrf.mxu1 }
 0x138   : > { %v701_v51 = vpack.c.bf16 %v404_v45, %v401_v43  ;;  %v721_v52 = vpack.c.bf16 %v436_v46, %v433_v44  ;;  %v396_v53 = vadd.f32 %v627_v18, %v395_v49  ;;  %v428_v54 = vadd.f32 %v627_v18, %v427_v50 }
 0x13a   : > { %725 = vst [vmem:[%s1173_s28 + $0x18] sm:$0xff] %v701_v51   ;;  %729 = vst [vmem:[%s1173_s28 + $0x38] sm:$0xff] %v721_v52   ;;  %v696_v55 = vpack.c.bf16 %v396_v53, %v393_v47  ;;  %v716_v56 = vpack.c.bf16 %v428_v54, %v425_v48 }
 0x13c   : > { %724 = vst [vmem:[%s1173_s28 + $0x10] sm:$0xff] %v696_v55   ;;  %728 = vst [vmem:[%s1173_s28 + $0x30] sm:$0xff] %v716_v56  }
 0x13d   : > { %938 = shalt.err (!%p935_p0)
}
 0x13e   : > { %s939_s11 = scalar_lea.hbm %s1186_s4, 1024  ;;  %s943_s30 = scalar_lea.hbm %s1236_s3, 2048 }
 0x13f   : > { %p940_p5 = scmp.ne.s32.totalorder %s1186_s4, %s939_s11  ;;  %p944_p4 = scmp.lt.s32.totalorder %s1186_s4, %s1236_s3 }
 0x140   : > { %p945_p6 = scmp.lt.s32.totalorder %s943_s30, %s939_s11 }
 0x141   : > { %p941_p2 = pnand %p940_p5, %p1252_p11 }
 0x142   : > { %p946_p8 = por %p945_p6, %p944_p4 }
 0x143   : > { %p942_p1 = pneg %p941_p2 }
 0x145   : > { %p947_p3 = pnand %p946_p8, %p942_p1 }
 0x147   : > { %950 = shalt.err (!%p947_p3)
}
 0x148   : > { %s1000_s20 = smov 64   ;;  %s1001_s28 = smov 4  }
 0x149   : > { %800 = dma.vmem_to_hbm [thread:$0]  (%p1252_p11), %s1181_s29, 1024, %s1186_s4, %s520_s16, %s1000_s20, %s1000_s20, %s1001_s28  }
 0x14a PF: > { %s548_s17 = sand.u32 1, %s981_s12   ;;  %p1253_p7 = scmp.ne.s32.totalorder %s1242_s19, 0 }
 0x14b   : > { %p1254_p9 = scmp.ge.s32.totalorder %s993_s15, 2  ;;  %s549_s22 = scalar_lea.sflag [#allocation4], %s548_s17 }
 0x14d   : > { %p811_p10 = pnand %p1254_p9, %p1253_p7 }
 0x14f   : > { %p812_p12 = pneg %p811_p10 }
 0x151   : > { %976 = dma.done.wait (%p812_p12), %s549_s22, 1024  }
 0x152   : > { %978 = vsyncadd (%p812_p12), %s549_s22, 4294966272  ;;  %p17_p13 = scmp.ge.s32.totalorder %s1076_s24, 4   ;;  %s1255_s12 = smov %s985_s13 }
 0x153   : > { %s1256_s13 = smov %s989_s14  ;;  %s1257_s14 = smov %s1096_s5 }
 0x154   : > { %s1258_s15 = smov %s1076_s24  ;;  %19 = sbr.rel (!%p17_p13) target bundleno = 6 (0x6), region = 81 }
 0x159   :  { %554 = vsyncpa [#allocation3], 1 }
 0x15a   :  { %556 = vsyncpa [#allocation3 + $0x1], 1 }
 0x15b   :  { %557 = vsyncpa [#allocation6], 1 }
 0x15c   :  { %558 = vsyncpa [#allocation4], 1 }
 0x15d   :  { %560 = vsyncpa [#allocation4 + $0x1], 1 }

</bundles_post_ra>
